<compile_context>
chip_gen: v6e
topology: v6e:2x2x1
jax: 0.10.0
libtpu: 0.0.40
codegen_flags: <defaults>
</compile_context>

<pallas_src>
import functools
import math

import jax
import jax.numpy as jnp
from jax.experimental import pallas as pl
from jax.experimental.pallas import tpu as pltpu


# ------------------------------------------------------------------ kernel ---

def layernorm_kernel(x_ref, g_ref, b_ref, o_ref, *, eps, features):
    # x: (tm, D) tile in native dtype, g/b: (1, D) f32 rows, o: (tm, D)
    x = x_ref[...].astype(jnp.float32)
    g = g_ref[...]
    b = b_ref[...]

    mean = jnp.mean(x, axis=-1, keepdims=True)                  # XLU reduce
    centered = x - mean
    # torch .std() default: unbiased (divides by N-1); eps added to std.
    var = jnp.sum(centered * centered, axis=-1, keepdims=True) / jnp.float32(
        features - 1)
    std = jnp.sqrt(var)                                         # EUP
    inv = pl.reciprocal(std + eps, approx=False)                # exact 1/(std+eps)

    o_ref[...] = (g * (centered * inv) + b).astype(o_ref.dtype)


# ----------------------------------------------------------------- wrapper ---

def _vmem_capacity_bytes():
    try:
        return int(pltpu.get_tpu_info().vmem_capacity_bytes)
    except Exception:
        return 64 * 1024 * 1024  # conservative (v7x per-TC)


def _round_down(x, m):
    return (x // m) * m


def _choose_row_tile(m, d, itemsize):
    """Byte-budgeted row tile.

    Budget: 4 live double-buffered (tm, D) blocks (2x input + 2x output) must
    fit ~3/8 of physical VMEM, capped at 32 MiB. Ensures >= ~4 grid steps when
    M allows so both v7x TensorCores get work.
    """
    # Sublane packing: 8 rows for 4-byte dtypes, 16 for bf16, 32 for 1-byte.
    mult = 8 * max(1, 4 // itemsize)

    cap = _vmem_capacity_bytes()
    live_budget = min((cap * 3) // 8, 32 * 1024 * 1024)   # ~24 MiB v7x, 32 MiB v5e/v6e
    block_budget = max(live_budget // 4, mult * d * itemsize)

    tm = max(mult, _round_down(block_budget // (d * itemsize), mult))

    # Keep >= 4 grid steps when the row count permits (megacore / pipelining).
    min_steps = 4
    if m >= min_steps * mult:
        tm = min(tm, max(mult, _round_down(m // min_steps, mult)))

    if tm >= m:
        return m  # full first dim is always a legal block shape
    return tm


def pallas_layer_norm(x, gamma, beta, eps=1e-6):
    """x: (..., D) float32/bfloat16, gamma/beta: (D,) -> same shape/dtype as x."""
    orig_shape = x.shape
    D = orig_shape[-1]
    M = math.prod(orig_shape[:-1])
    x2d = x.reshape(M, D)

    itemsize = jnp.dtype(x.dtype).itemsize
    tm = _choose_row_tile(M, D, itemsize)
    grid = (pl.cdiv(M, tm),)

    cap = _vmem_capacity_bytes()
    vmem_limit = min(cap // 2, 64 * 1024 * 1024)  # 32 MiB on v7x, 64 MiB elsewhere

    kern = functools.partial(layernorm_kernel, eps=eps, features=D)

    out = pl.pallas_call(
        kern,
        out_shape=jax.ShapeDtypeStruct((M, D), x.dtype),
        grid_spec=pltpu.PrefetchScalarGridSpec(
            num_scalar_prefetch=0,
            grid=grid,
            in_specs=[
                pl.BlockSpec((tm, D), lambda i: (i, 0)),   # x row tile
                pl.BlockSpec((1, D), lambda i: (0, 0)),    # gamma (resident)
                pl.BlockSpec((1, D), lambda i: (0, 0)),    # beta  (resident)
            ],
            out_specs=pl.BlockSpec((tm, D), lambda i: (i, 0)),
        ),
        compiler_params=pltpu.CompilerParams(
            dimension_semantics=("parallel",),             # v7x 2-TC sharding
            vmem_limit_bytes=vmem_limit,
        ),
        cost_estimate=pl.CostEstimate(
            flops=8 * M * D,
            transcendentals=M,                             # sqrt per row
            bytes_accessed=2 * M * D * itemsize + 2 * D * 4,
        ),
    )(x2d,
      gamma.astype(jnp.float32).reshape(1, D),
      beta.astype(jnp.float32).reshape(1, D))

    return out.reshape(orig_shape)


# ------------------------------------------------------------------- main ----

if __name__ == "__main__":
    EPS = 1e-6
    root = jax.random.PRNGKey(0)
    kx, kg, kb, kx2, kx3 = jax.random.split(root, 5)

    # plain-JAX reference matching the torch semantics exactly
    def ref_layer_norm(x, gamma, beta, eps):
        x = x.astype(jnp.float32)
        mean = jnp.mean(x, axis=-1, keepdims=True)
        std = jnp.std(x, axis=-1, keepdims=True, ddof=1)   # unbiased, like torch
        return gamma * (x - mean) / (std + eps) + beta

    B, S, D = 2, 8, 32   # batch, seq, features -> M = 16 rows, D on lane axis
    gamma = 1.0 + 0.1 * jax.random.normal(kg, (D,), dtype=jnp.float32)
    beta = 0.1 * jax.random.normal(kb, (D,), dtype=jnp.float32)

    # Case 1: canonical small shape, f32 (single full block).
    x = jax.random.normal(kx, (B, S, D), dtype=jnp.float32)
    out = jax.block_until_ready(pallas_layer_norm(x, gamma, beta, eps=EPS))
    exp = ref_layer_norm(x, gamma, beta, EPS)
    assert out.shape == exp.shape
    assert jnp.allclose(out, exp, atol=1e-4, rtol=1e-4), "f32 mismatch vs reference"

    # Case 2: ragged row count (M = 50) -> exercises cdiv grid + clipped tail block.
    x2 = jax.random.normal(kx2, (2, 25, D), dtype=jnp.float32)
    out2 = jax.block_until_ready(pallas_layer_norm(x2, gamma, beta, eps=EPS))
    exp2 = ref_layer_norm(x2, gamma, beta, EPS)
    assert jnp.allclose(out2, exp2, atol=1e-4, rtol=1e-4), "ragged mismatch vs reference"

    # Case 3: bf16 activations end-to-end (f32 math inside the kernel).
    x3 = jax.random.normal(kx3, (B, S, D), dtype=jnp.float32).astype(jnp.bfloat16)
    out3 = jax.block_until_ready(pallas_layer_norm(x3, gamma, beta, eps=EPS))
    exp3 = ref_layer_norm(x3, gamma, beta, EPS).astype(jnp.bfloat16)
    assert out3.dtype == jnp.bfloat16
    assert jnp.allclose(out3.astype(jnp.float32), exp3.astype(jnp.float32),
                        atol=3e-2, rtol=3e-2), "bf16 mismatch vs reference"

    print("KERNEL_OK")
</pallas_src>

<mosaic_0001>
module attributes {stable_mosaic.version = 11 : i64} {
  func.func @layernorm_kernel(%arg0: i32, %arg1: memref<16x32xf32, #tpu.memory_space<vmem>>, %arg2: memref<1x32xf32, #tpu.memory_space<vmem>>, %arg3: memref<1x32xf32, #tpu.memory_space<vmem>>, %arg4: memref<16x32xf32, #tpu.memory_space<vmem>>) attributes {dimension_semantics = [#tpu.dimension_semantics<parallel>], iteration_bounds = array<i64: 1>, scalar_prefetch = 0 : i64, scratch_operands = 0 : i64, tpu.core_type = #tpu.core_type<tc>, window_params = [{transform_indices = @transform_0, window_bounds = array<i64: 16, 32>}, {pipeline_mode = #tpu.pipeline_mode<synchronous>, transform_indices = @transform_1, window_bounds = array<i64: 1, 32>}, {pipeline_mode = #tpu.pipeline_mode<synchronous>, transform_indices = @transform_2, window_bounds = array<i64: 1, 32>}, {transform_indices = @transform_3, window_bounds = array<i64: 16, 32>}]} {
    %c0 = arith.constant 0 : index
    %c0_0 = arith.constant 0 : index
    %0 = vector.load %arg1[%c0, %c0_0] : memref<16x32xf32, #tpu.memory_space<vmem>>, vector<16x32xf32>
    %c0_1 = arith.constant 0 : index
    %c0_2 = arith.constant 0 : index
    %1 = vector.load %arg2[%c0_1, %c0_2] : memref<1x32xf32, #tpu.memory_space<vmem>>, vector<1x32xf32>
    %c0_3 = arith.constant 0 : index
    %c0_4 = arith.constant 0 : index
    %2 = vector.load %arg3[%c0_3, %c0_4] : memref<1x32xf32, #tpu.memory_space<vmem>>, vector<1x32xf32>
    %cst = arith.constant dense<0.000000e+00> : vector<16xf32>
    %3 = vector.multi_reduction <add>, %0, %cst [1] : vector<16x32xf32> to vector<16xf32>
    %4 = vector.shape_cast %3 : vector<16xf32> to vector<16x1xf32>
    %cst_5 = arith.constant 3.200000e+01 : f32
    %5 = vector.broadcast %cst_5 : f32 to vector<16x1xf32>
    %6 = arith.divf %4, %5 : vector<16x1xf32>
    %7 = vector.broadcast %6 : vector<16x1xf32> to vector<16x32xf32>
    %8 = arith.subf %0, %7 : vector<16x32xf32>
    %9 = arith.mulf %8, %8 : vector<16x32xf32>
    %cst_6 = arith.constant dense<0.000000e+00> : vector<16xf32>
    %10 = vector.multi_reduction <add>, %9, %cst_6 [1] : vector<16x32xf32> to vector<16xf32>
    %11 = vector.shape_cast %10 : vector<16xf32> to vector<16x1xf32>
    %cst_7 = arith.constant 3.100000e+01 : f32
    %12 = vector.broadcast %cst_7 : f32 to vector<16x1xf32>
    %13 = arith.divf %11, %12 : vector<16x1xf32>
    %14 = math.sqrt %13 : vector<16x1xf32>
    %cst_8 = arith.constant 9.99999997E-7 : f32
    %15 = vector.broadcast %cst_8 : f32 to vector<16x1xf32>
    %16 = arith.addf %14, %15 : vector<16x1xf32>
    %17 = tpu.reciprocal %16 : vector<16x1xf32> -> vector<16x1xf32>
    %18 = vector.broadcast %17 : vector<16x1xf32> to vector<16x32xf32>
    %19 = arith.mulf %8, %18 : vector<16x32xf32>
    %20 = vector.broadcast %1 : vector<1x32xf32> to vector<16x32xf32>
    %21 = arith.mulf %20, %19 : vector<16x32xf32>
    %22 = vector.broadcast %2 : vector<1x32xf32> to vector<16x32xf32>
    %23 = arith.addf %21, %22 : vector<16x32xf32>
    %c0_9 = arith.constant 0 : index
    %c0_10 = arith.constant 0 : index
    %24 = vector.load %arg4[%c0_9, %c0_10] : memref<16x32xf32, #tpu.memory_space<vmem>>, vector<16x32xf32>
    tpu.vector_store %arg4[%c0_9, %c0_10], %23 {strides = array<i32>} : memref<16x32xf32, #tpu.memory_space<vmem>>, vector<16x32xf32>,
    return
  }
  func.func @transform_0(%arg0: i32) -> (i32, i32) {
    %c0_i32 = arith.constant 0 : i32
    %c0_i32_0 = arith.constant 0 : i32
    return %arg0, %c0_i32 : i32, i32
  }
  func.func @transform_1(%arg0: i32) -> (i32, i32) {
    %c0_i32 = arith.constant 0 : i32
    %c0_i32_0 = arith.constant 0 : i32
    %c0_i32_1 = arith.constant 0 : i32
    return %c0_i32, %c0_i32_0 : i32, i32
  }
  func.func @transform_2(%arg0: i32) -> (i32, i32) {
    %c0_i32 = arith.constant 0 : i32
    %c0_i32_0 = arith.constant 0 : i32
    %c0_i32_1 = arith.constant 0 : i32
    return %c0_i32, %c0_i32_0 : i32, i32
  }
  func.func @transform_3(%arg0: i32) -> (i32, i32) {
    %c0_i32 = arith.constant 0 : i32
    %c0_i32_0 = arith.constant 0 : i32
    return %arg0, %c0_i32 : i32, i32
  }
}

</mosaic_0001>

<bundles_post_ra>
// kernel: tpu_custom_call.1
= control target key start
LH: loop header
LB: loop body
LE: loop exit
PB: predicated region body
PF: predicated region fallthrough
CT: control target
= control target key end

     0   :  { %8 = vsyncpa [#allocation3], 0  ;;  %s217_s0 = inlined_call_operand.hbm [shape: f32[16,32], index: 0, kind: input, shape index: {}]   ;;  %s218_s1 = inlined_call_operand.vmem [shape: f32[1,32], index: 1, kind: input, shape index: {}]   ;;  %s219_s2 = inlined_call_operand.vmem [shape: f32[1,32], index: 2, kind: input, shape index: {}]   ;;  %s220_s3 = inlined_call_operand.hbm [shape: f32[16,32], index: 3, kind: output, shape index: {}]  }
   0x1   :  { %9 = vsyncpa [#allocation4], 0  ;;  %s169_s12 = smov [#allocation2]  }
   0x2   :  { %s15_s13 = sshll.u32 %s169_s12, 4  ;;  %s16_s13 = int_to_ptr.vmem [resolvable:$true] %s15_s13 }
   0x3   :  { %s133_s14 = scalar_lea.vmem %s16_s13, 256  ;;  %p138_p1 = scmp.lt.s32.totalorder %s16_s13, %s16_s13 }
   0x4   :  { %p134_p0 = scmp.ne.s32.totalorder %s16_s13, %s133_s14  ;;  %p139_p2 = scmp.lt.s32.totalorder %s133_s14, %s133_s14 }
   0x6   :  { %p140_p3 = por %p139_p2, %p138_p1 }
   0x8   :  { %p141_p4 = pnand %p140_p3, %p134_p0 }
   0xa   :  { %144 = shalt.err (!%p141_p4)
}
   0xb   :  { %s170_s15 = smov 128   ;;  %s171_s16 = smov 8  }
   0xc   :  { %21 = dma.hbm_to_vmem [thread:$0]  %s217_s0, 256, %s16_s13, [#allocation3], %s170_s15, %s170_s15, %s171_s16  }
   0xd   :  { %165 = dma.done.wait [#allocation3], 256  }
   0xe   :  { %166 = vsyncadd [#allocation3], 4294967040  ;;  %vm33_vm0 = vcmask 261120   ;;  %v29_v0 = vld [vmem:[#allocation2] sm:$0xff]  ;;  %v30_v1 = vld [vmem:[#allocation2 + $0x8] sm:$0xff]  ;;  %s172_s22 = smov [#allocation5]  }
   0xf   :  { %v34_v2 = vsel %vm33_vm0, %v29_v0, 0.0  ;;  %v37_v3 = vsel %vm33_vm0, %v30_v1, 0.0  ;;  %v111_v31 = vld [vmem:[%s218_s1] ss:$0 sm:$0xff]  ;;  %s99_s23 = sshll.u32 %s172_s22, 4  ;;  %s100_s23 = int_to_ptr.vmem [resolvable:$true] %s99_s23 }
  0x10   :  { %35 = vadd.xlane.f32.xlu0 %v34_v2  ;;  %v112_v33 = vld [vmem:[%s219_s2] ss:$0 sm:$0xff]  ;;  %s145_s24 = scalar_lea.vmem %s100_s23, 256  ;;  %p150_p6 = scmp.lt.s32.totalorder %s100_s23, %s100_s23 }
  0x11   :  { %p146_p5 = scmp.ne.s32.totalorder %s100_s23, %s145_s24  ;;  %p151_p7 = scmp.lt.s32.totalorder %s145_s24, %s145_s24 }
  0x13   :  { %p152_p8 = por %p151_p7, %p150_p6 }
  0x14   :  { %38 = vadd.xlane.f32.xlu0 %v37_v3 }
  0x15   :  { %p153_p9 = pnand %p152_p8, %p146_p5 }
  0x99   :  { %v36_v4 = vpop.xlane.xlu0 %35 }
  0x9a   :  { %v41_v5 = vmul.f32 0.03125, %v36_v4 }
  0x9c   :  { %v43_v6 = vsub.f32 %v29_v0, %v41_v5 }
  0x9d   :  { %v39_v7 = vpop.xlane.xlu0 %38 }
  0x9e   :  { %v42_v8 = vmul.f32 0.03125, %v39_v7  ;;  %v45_v9 = vmul.f32 %v43_v6, %v43_v6 }
  0xa0   :  { %v44_v10 = vsub.f32 %v30_v1, %v42_v8  ;;  %v47_v11 = vsel %vm33_vm0, %v45_v9, 0.0 }
  0xa1   :  { %48 = vadd.xlane.f32.xlu1 %v47_v11 }
  0xa2   :  { %v46_v12 = vmul.f32 %v44_v10, %v44_v10 }
  0xa4   :  { %v50_v13 = vsel %vm33_vm0, %v46_v12, 0.0 }
  0xa5   :  { %51 = vadd.xlane.f32.xlu1 %v50_v13 }
 0x12a   :  { %v49_v14 = vpop.xlane.xlu1 %48 }
 0x12b   :  { %v54_v15 = vmul.f32 0.032258064, %v49_v14 }
 0x12d   :  { %117 = vrsqrt.f32 %v54_v15  ;;  %vm58_vm1 = vcmp.eq.f32.partialorder %v54_v15, inf  ;;  %v61_v20 = vand.u32 2147483648, %v54_v15  ;;  %vm60_vm2 = vcmp.eq.f32.partialorder %v54_v15, 0.0 }
 0x12e   :  { %v52_v16 = vpop.xlane.xlu1 %51 }
 0x12f   :  { %v55_v17 = vmul.f32 0.032258064, %v52_v16 }
 0x131   :  { %119 = vrsqrt.f32 %v55_v17  ;;  %vm65_vm3 = vcmp.eq.f32.partialorder %v55_v17, inf  ;;  %v68_v26 = vand.u32 2147483648, %v55_v17  ;;  %vm67_vm4 = vcmp.eq.f32.partialorder %v55_v17, 0.0 }
 0x13a   :  { %v118_v18 = vpop.eup %117 }
 0x13b   :  { %v57_v19 = vmul.f32 %v118_v18, %v54_v15 }
 0x13d   :  { %v59_v21 = vsel %vm58_vm1, %v54_v15, %v57_v19 }
 0x13e   :  { %v120_v22 = vpop.eup %119  ;;  %v62_v23 = vsel %vm60_vm2, %v61_v20, %v59_v21 }
 0x13f   :  { %v70_v24 = vadd.f32 1e-06, %v62_v23  ;;  %v64_v25 = vmul.f32 %v120_v22, %v55_v17 }
 0x141   :  { %121 = vrcp.f32 %v70_v24  ;;  %v66_v27 = vsel %vm65_vm3, %v55_v17, %v64_v25 }
 0x142   :  { %v69_v28 = vsel %vm67_vm4, %v68_v26, %v66_v27 }
 0x143   :  { %v71_v29 = vadd.f32 1e-06, %v69_v28 }
 0x145   :  { %123 = vrcp.f32 %v71_v29 }
 0x14e   :  { %v122_v30 = vpop.eup %121 }
 0x14f   :  { %v74_v32 = vmul.f32 %v122_v30, %v43_v6 }
 0x151   :  { %v82_v34 = vmul.f32 %v111_v31, %v74_v32 }
 0x152   :  { %v124_v35 = vpop.eup %123 }
 0x153   :  { %v75_v36 = vmul.f32 %v124_v35, %v44_v10  ;;  %v90_v37 = vadd.f32 %v112_v33, %v82_v34 }
 0x155   :  { %v83_v38 = vmul.f32 %v111_v31, %v75_v36  ;;  %92 = vst.msk [vmem:[#allocation5] sm:$0xff] %vm33_vm0, %v90_v37 }
 0x157   :  { %v91_v39 = vadd.f32 %v112_v33, %v83_v38 }
 0x159   :  { %93 = vst.msk [vmem:[#allocation5 + $0x8] sm:$0xff] %vm33_vm0, %v91_v39 }
 0x15a   :  { %156 = shalt.err (!%p153_p9)
}
 0x15b   :  { %105 = dma.vmem_to_hbm [thread:$0]  %s100_s23, 256, %s220_s3, [#allocation4], %s170_s15, %s170_s15, %s171_s16  }
 0x15c   :  { %167 = dma.done.wait [#allocation4], 256  }
 0x15d   :  { %168 = vsyncadd [#allocation4], 4294967040 }
 0x15e   :  { %109 = vsyncpa [#allocation3], 1 }
 0x15f   :  { %110 = vsyncpa [#allocation4], 1 }

</bundles_post_ra>
